<compile_context>
chip_gen: v7x
topology: tpu7x:2x2x1
jax: 0.10.0
libtpu: 0.0.40
codegen_flags: <defaults>
</compile_context>

<pallas_src>
import functools

import jax
import jax.numpy as jnp
from jax import lax
from jax.experimental import pallas as pl
from jax.experimental.pallas import tpu as pltpu


def _resnet_block_kernel(k, shifts, x_ref, mask_ref, w1_ref, w2_ref, out_ref, cols_ref):
    # x_ref / out_ref : (R, L)           R = images_per_group * C (8 for C=4), L = groups_per_block * H*W
    # mask_ref        : (k*k, L)         per-tap zero-padding validity mask (f32, 0/1)
    # w*_ref          : (R, k*k*R + 1)   BN-folded, block-diagonal weights; last column = folded bias
    # cols_ref        : (k*k*R + 1, L)   VMEM im2col scratch; last row is a constant-ones row
    R, L = out_ref.shape
    KK = k * k

    # ones row for the folded bias (re-written every step: scratch does not persist
    # reliably across a "parallel" grid axis split over TensorCores)
    cols_ref[pl.ds(KK * R, 1), :] = jnp.ones((1, L), jnp.float32)

    def conv(src, w_ref):
        # im2col: all k*k shifted/masked taps into VMEM (aligned 8-sublane stores),
        # then one MXU contraction (includes the bias via the ones row).
        for t in range(KK):
            s = shifts[t]
            rolled = src if s == 0 else pltpu.roll(src, shift=(-s) % L, axis=1)
            cols_ref[pl.ds(t * R, R), :] = rolled * mask_ref[pl.ds(t, 1), :]
        return jnp.dot(w_ref[...], cols_ref[...], preferred_element_type=jnp.float32)

    x = x_ref[...].astype(jnp.float32)

    # conv1 (+folded BN1) + ReLU
    y1 = jnp.maximum(conv(x, w1_ref), 0.0)

    # TODO(synk): nn.Dropout(p=0.5) is identity in eval mode; training-mode RNG mask omitted.

    # conv2 (+folded BN2), then residual add
    y2 = conv(y1, w2_ref)
    out_ref[...] = (x + y2).astype(out_ref.dtype)


def _vmem_budget_bytes():
    """~75% of physical VMEM (48 MiB on v7x's 64 MiB, 96 MiB on v5e/v6e's 128 MiB)."""
    cap = 64 << 20
    try:
        cap = int(pltpu.get_tpu_info().vmem_capacity_bytes)
    except Exception:
        pass
    return int(min(cap * 3 // 4, 96 * 1024 * 1024))


def _groups_per_block(NP, HW, R, k, budget_bytes):
    """Pick image-groups per grid step: big lane blocks, capped by VMEM, grid >= 2 steps if possible."""
    # cols + double-buffered x/out + double-buffered mask + temporary-slab slack, per lane (f32)
    bytes_per_lane = 4 * ((k * k * R + 1) + 10 * R + 2 * k * k) + 64
    max_lanes = max(HW, budget_bytes // bytes_per_lane)
    target_lanes = min(max_lanes, 128 * 1024)
    npb = max(1, min(NP, target_lanes // HW))
    if NP >= 2:
        npb = min(npb, NP // 2)   # keep >= 2 grid steps: v7x dual-TC split + pipelining
    npb = max(1, npb)
    for d in range(npb, 0, -1):
        if NP % d == 0 and ((d * HW) % 128 == 0 or d == NP):
            return d
    return NP  # block == full array dims (always legal)


def _fold_weights(w_oihw, b, gamma, beta, mean, var, C, k, G, eps):
    """Fold eval-mode BN into the conv, block-diagonalize over the G packed images,
    and append the folded bias as an extra weight column (paired with a ones row in cols)."""
    s = gamma / jnp.sqrt(var + eps)                               # (C,)
    w_tap = jnp.transpose(w_oihw * s[:, None, None, None], (0, 2, 3, 1)).reshape(C, k * k, C)
    b_eff = (b - mean) * s + beta                                 # (C,)
    R = G * C
    Wb = jnp.zeros((R, k * k, R), jnp.float32)
    for g in range(G):
        Wb = Wb.at[g * C:(g + 1) * C, :, g * C:(g + 1) * C].set(w_tap)
    Wb = Wb.reshape(R, k * k * R)                                 # column order: tap*R + (img*C + in_ch)
    return jnp.concatenate([Wb, jnp.tile(b_eff, G)[:, None]], axis=1).astype(jnp.float32)


def resnet_block(x_nchw, params, *, kernel_size=3, stride=1, padding=1, eps=1e-5):
    assert stride == 1 and padding == (kernel_size - 1) // 2, \
        "residual add requires 'same' conv (stride=1, padding=(k-1)//2)"
    N, C, H, W = x_nchw.shape
    k = kernel_size
    HW = H * W

    # Pack G images per 8-sublane group (G=2 for C=4).  For C that is already a
    # multiple of 8 no packing is needed (G=1).
    G = 8 // C if (C <= 8 and 8 % C == 0) else 1
    R = G * C
    N_pad = ((N + G - 1) // G) * G
    if N_pad != N:
        x_nchw = jnp.concatenate(
            [x_nchw, jnp.zeros((N_pad - N, C, H, W), x_nchw.dtype)], axis=0)
    NP = N_pad // G                                  # number of packed image groups

    budget = _vmem_budget_bytes()
    NPB = _groups_per_block(NP, HW, R, k, budget)    # groups per grid step
    grid = (NP // NPB,)
    L = NPB * HW                                     # lanes per grid step
    KCOLS = k * k * R + 1

    # NCHW -> packed (R, NP*HW): (image-in-group, channel) on sublanes, pixels on lanes.
    x_packed = jnp.transpose(x_nchw.reshape(NP, G, C, HW), (1, 2, 0, 3)).reshape(R, NP * HW)

    # Per-tap lane shifts (static) and zero-padding masks (passed as a small f32 input;
    # constant block index -> fetched into VMEM once).
    shifts = []
    mask_rows = []
    hh = jnp.arange(HW, dtype=jnp.int32) // W
    ww = jnp.arange(HW, dtype=jnp.int32) % W
    for kh in range(k):
        for kw in range(k):
            dh, dw = kh - padding, kw - padding
            shifts.append(dh * W + dw)
            mask_rows.append((hh + dh >= 0) & (hh + dh < H) & (ww + dw >= 0) & (ww + dw < W))
    mask = jnp.tile(jnp.stack(mask_rows).astype(jnp.float32), (1, NPB))   # (k*k, L)

    w1f = _fold_weights(params["w1"], params["b1"], params["gamma1"], params["beta1"],
                        params["mean1"], params["var1"], C, k, G, eps)
    w2f = _fold_weights(params["w2"], params["b2"], params["gamma2"], params["beta2"],
                        params["mean2"], params["var2"], C, k, G, eps)

    kernel = functools.partial(_resnet_block_kernel, k, tuple(shifts))

    itemsize = jnp.dtype(x_nchw.dtype).itemsize
    cost = pl.CostEstimate(
        flops=int(4 * C * C * k * k * N_pad * HW),            # 2 convs, 2*M*K*Npix each
        transcendentals=0,
        bytes_accessed=int(2 * C * N_pad * HW * itemsize))

    # NOTE: for very large H*W an additional HW-tiling grid axis with halo rows would be
    # needed so a single group still fits the per-generation VMEM budget.
    out_packed = pl.pallas_call(
        kernel,
        out_shape=jax.ShapeDtypeStruct((R, NP * HW), x_nchw.dtype),
        grid_spec=pltpu.PrefetchScalarGridSpec(
            num_scalar_prefetch=0,
            grid=grid,
            in_specs=[
                pl.BlockSpec((R, L), lambda b: (0, b)),          # x: packed lane/sublane-dense slab
                pl.BlockSpec((k * k, L), lambda b: (0, 0)),      # padding masks (fetched once)
                pl.BlockSpec((R, KCOLS), lambda b: (0, 0)),      # folded weights 1
                pl.BlockSpec((R, KCOLS), lambda b: (0, 0)),      # folded weights 2
            ],
            out_specs=pl.BlockSpec((R, L), lambda b: (0, b)),
            scratch_shapes=[pltpu.VMEM((KCOLS, L), jnp.float32)],
        ),
        compiler_params=pltpu.CompilerParams(
            dimension_semantics=("parallel",),     # group blocks independent (v7x dual-TC)
            vmem_limit_bytes=budget,
        ),
        cost_estimate=cost,
    )(x_packed, mask, w1f, w2f)

    # packed (R, NP*HW) -> NCHW, drop batch padding
    out = jnp.transpose(out_packed.reshape(G, C, NP, HW), (2, 0, 1, 3)).reshape(N_pad, C, H, W)
    return out[:N]


def reference_forward(x_nchw, params, *, padding=1, eps=1e-5):
    """Pure-JAX (XLA) reference in NCHW, mirroring the PyTorch module in eval mode."""
    def conv(x, w, b):
        y = lax.conv_general_dilated(
            x, w, window_strides=(1, 1),
            padding=((padding, padding), (padding, padding)),
            dimension_numbers=("NCHW", "OIHW", "NCHW"))
        return y + b[None, :, None, None]

    def bn(x, g, be, m, v):
        inv = (g / jnp.sqrt(v + eps))[None, :, None, None]
        return (x - m[None, :, None, None]) * inv + be[None, :, None, None]

    h = conv(x_nchw, params["w1"], params["b1"])
    h = bn(h, params["gamma1"], params["beta1"], params["mean1"], params["var1"])
    h = jnp.maximum(h, 0.0)
    h = conv(h, params["w2"], params["b2"])
    h = bn(h, params["gamma2"], params["beta2"], params["mean2"], params["var2"])
    return x_nchw + h


if __name__ == "__main__":
    dim, k, stride, pad = 4, 3, 1, 1
    N, H, W = 2, 16, 16

    key = jax.random.PRNGKey(0)
    keys = jax.random.split(key, 13)

    params = {
        "w1": 0.1 * jax.random.normal(keys[0], (dim, dim, k, k), jnp.float32),
        "b1": 0.1 * jax.random.normal(keys[1], (dim,), jnp.float32),
        "gamma1": 1.0 + 0.1 * jax.random.normal(keys[2], (dim,), jnp.float32),
        "beta1": 0.1 * jax.random.normal(keys[3], (dim,), jnp.float32),
        "mean1": 0.1 * jax.random.normal(keys[4], (dim,), jnp.float32),
        "var1": jax.random.uniform(keys[5], (dim,), jnp.float32, 0.5, 1.5),
        "w2": 0.1 * jax.random.normal(keys[6], (dim, dim, k, k), jnp.float32),
        "b2": 0.1 * jax.random.normal(keys[7], (dim,), jnp.float32),
        "gamma2": 1.0 + 0.1 * jax.random.normal(keys[8], (dim,), jnp.float32),
        "beta2": 0.1 * jax.random.normal(keys[9], (dim,), jnp.float32),
        "mean2": 0.1 * jax.random.normal(keys[10], (dim,), jnp.float32),
        "var2": jax.random.uniform(keys[11], (dim,), jnp.float32, 0.5, 1.5),
    }
    x = jax.random.normal(keys[12], (N, dim, H, W), jnp.float32)

    out = resnet_block(x, params, kernel_size=k, stride=stride, padding=pad)
    out = jax.block_until_ready(out)

    ref = reference_forward(x, params, padding=pad)
    assert out.shape == x.shape and out.dtype == x.dtype
    max_err = float(jnp.max(jnp.abs(out - ref)))
    assert jnp.allclose(out, ref, atol=1e-4, rtol=1e-4), f"max abs err = {max_err}"

    print("KERNEL_OK")
</pallas_src>

<mosaic_0001>
module attributes {stable_mosaic.version = 11 : i64} {
  func.func @_resnet_block_kernel(%arg0: i32, %arg1: memref<8x256xf32, #tpu.memory_space<vmem>>, %arg2: memref<9x256xf32, #tpu.memory_space<vmem>>, %arg3: memref<8x73xf32, #tpu.memory_space<vmem>>, %arg4: memref<8x73xf32, #tpu.memory_space<vmem>>, %arg5: memref<8x256xf32, #tpu.memory_space<vmem>>, %arg6: memref<73x256xf32, #tpu.memory_space<vmem>>) attributes {dimension_semantics = [#tpu.dimension_semantics<parallel>], iteration_bounds = array<i64: 1>, scalar_prefetch = 0 : i64, scratch_operands = 1 : i64, tpu.core_type = #tpu.core_type<tc>, window_params = [{transform_indices = @transform_0, window_bounds = array<i64: 8, 256>}, {pipeline_mode = #tpu.pipeline_mode<synchronous>, transform_indices = @transform_1, window_bounds = array<i64: 9, 256>}, {pipeline_mode = #tpu.pipeline_mode<synchronous>, transform_indices = @transform_2, window_bounds = array<i64: 8, 73>}, {pipeline_mode = #tpu.pipeline_mode<synchronous>, transform_indices = @transform_3, window_bounds = array<i64: 8, 73>}, {transform_indices = @transform_4, window_bounds = array<i64: 8, 256>}]} {
    %cst = arith.constant 1.000000e+00 : f32
    %0 = vector.broadcast %cst : f32 to vector<1x256xf32>
    %c72 = arith.constant 72 : index
    %c0 = arith.constant 0 : index
    %1 = vector.load %arg6[%c72, %c0] : memref<73x256xf32, #tpu.memory_space<vmem>>, vector<1x256xf32>
    tpu.vector_store %arg6[%c72, %c0], %0 {strides = array<i32>} : memref<73x256xf32, #tpu.memory_space<vmem>>, vector<1x256xf32>,
    %c0_0 = arith.constant 0 : index
    %c0_1 = arith.constant 0 : index
    %2 = vector.load %arg1[%c0_0, %c0_1] : memref<8x256xf32, #tpu.memory_space<vmem>>, vector<8x256xf32>
    %c17_i32 = arith.constant 17 : i32
    %3 = tpu.dynamic_rotate %2 by %c17_i32 dim 1 : vector<8x256xf32>, i32 -> vector<8x256xf32>
    %c0_2 = arith.constant 0 : index
    %c0_3 = arith.constant 0 : index
    %4 = vector.load %arg2[%c0_2, %c0_3] : memref<9x256xf32, #tpu.memory_space<vmem>>, vector<1x256xf32>
    %5 = vector.broadcast %4 : vector<1x256xf32> to vector<8x256xf32>
    %6 = arith.mulf %3, %5 : vector<8x256xf32>
    %c0_4 = arith.constant 0 : index
    %c0_5 = arith.constant 0 : index
    %7 = vector.load %arg6[%c0_4, %c0_5] : memref<73x256xf32, #tpu.memory_space<vmem>>, vector<8x256xf32>
    tpu.vector_store %arg6[%c0_4, %c0_5], %6 {strides = array<i32>} : memref<73x256xf32, #tpu.memory_space<vmem>>, vector<8x256xf32>,
    %c16_i32 = arith.constant 16 : i32
    %8 = tpu.dynamic_rotate %2 by %c16_i32 dim 1 : vector<8x256xf32>, i32 -> vector<8x256xf32>
    %c1 = arith.constant 1 : index
    %c0_6 = arith.constant 0 : index
    %9 = vector.load %arg2[%c1, %c0_6] : memref<9x256xf32, #tpu.memory_space<vmem>>, vector<1x256xf32>
    %10 = vector.broadcast %9 : vector<1x256xf32> to vector<8x256xf32>
    %11 = arith.mulf %8, %10 : vector<8x256xf32>
    %c8 = arith.constant 8 : index
    %c0_7 = arith.constant 0 : index
    %12 = vector.load %arg6[%c8, %c0_7] : memref<73x256xf32, #tpu.memory_space<vmem>>, vector<8x256xf32>
    tpu.vector_store %arg6[%c8, %c0_7], %11 {strides = array<i32>} : memref<73x256xf32, #tpu.memory_space<vmem>>, vector<8x256xf32>,
    %c15_i32 = arith.constant 15 : i32
    %13 = tpu.dynamic_rotate %2 by %c15_i32 dim 1 : vector<8x256xf32>, i32 -> vector<8x256xf32>
    %c2 = arith.constant 2 : index
    %c0_8 = arith.constant 0 : index
    %14 = vector.load %arg2[%c2, %c0_8] : memref<9x256xf32, #tpu.memory_space<vmem>>, vector<1x256xf32>
    %15 = vector.broadcast %14 : vector<1x256xf32> to vector<8x256xf32>
    %16 = arith.mulf %13, %15 : vector<8x256xf32>
    %c16 = arith.constant 16 : index
    %c0_9 = arith.constant 0 : index
    %17 = vector.load %arg6[%c16, %c0_9] : memref<73x256xf32, #tpu.memory_space<vmem>>, vector<8x256xf32>
    tpu.vector_store %arg6[%c16, %c0_9], %16 {strides = array<i32>} : memref<73x256xf32, #tpu.memory_space<vmem>>, vector<8x256xf32>,
    %c1_i32 = arith.constant 1 : i32
    %18 = tpu.dynamic_rotate %2 by %c1_i32 dim 1 : vector<8x256xf32>, i32 -> vector<8x256xf32>
    %c3 = arith.constant 3 : index
    %c0_10 = arith.constant 0 : index
    %19 = vector.load %arg2[%c3, %c0_10] : memref<9x256xf32, #tpu.memory_space<vmem>>, vector<1x256xf32>
    %20 = vector.broadcast %19 : vector<1x256xf32> to vector<8x256xf32>
    %21 = arith.mulf %18, %20 : vector<8x256xf32>
    %c24 = arith.constant 24 : index
    %c0_11 = arith.constant 0 : index
    %22 = vector.load %arg6[%c24, %c0_11] : memref<73x256xf32, #tpu.memory_space<vmem>>, vector<8x256xf32>
    tpu.vector_store %arg6[%c24, %c0_11], %21 {strides = array<i32>} : memref<73x256xf32, #tpu.memory_space<vmem>>, vector<8x256xf32>,
    %c4 = arith.constant 4 : index
    %c0_12 = arith.constant 0 : index
    %23 = vector.load %arg2[%c4, %c0_12] : memref<9x256xf32, #tpu.memory_space<vmem>>, vector<1x256xf32>
    %24 = vector.broadcast %23 : vector<1x256xf32> to vector<8x256xf32>
    %25 = arith.mulf %2, %24 : vector<8x256xf32>
    %c32 = arith.constant 32 : index
    %c0_13 = arith.constant 0 : index
    %26 = vector.load %arg6[%c32, %c0_13] : memref<73x256xf32, #tpu.memory_space<vmem>>, vector<8x256xf32>
    tpu.vector_store %arg6[%c32, %c0_13], %25 {strides = array<i32>} : memref<73x256xf32, #tpu.memory_space<vmem>>, vector<8x256xf32>,
    %c255_i32 = arith.constant 255 : i32
    %27 = tpu.dynamic_rotate %2 by %c255_i32 dim 1 : vector<8x256xf32>, i32 -> vector<8x256xf32>
    %c5 = arith.constant 5 : index
    %c0_14 = arith.constant 0 : index
    %28 = vector.load %arg2[%c5, %c0_14] : memref<9x256xf32, #tpu.memory_space<vmem>>, vector<1x256xf32>
    %29 = vector.broadcast %28 : vector<1x256xf32> to vector<8x256xf32>
    %30 = arith.mulf %27, %29 : vector<8x256xf32>
    %c40 = arith.constant 40 : index
    %c0_15 = arith.constant 0 : index
    %31 = vector.load %arg6[%c40, %c0_15] : memref<73x256xf32, #tpu.memory_space<vmem>>, vector<8x256xf32>
    tpu.vector_store %arg6[%c40, %c0_15], %30 {strides = array<i32>} : memref<73x256xf32, #tpu.memory_space<vmem>>, vector<8x256xf32>,
    %c241_i32 = arith.constant 241 : i32
    %32 = tpu.dynamic_rotate %2 by %c241_i32 dim 1 : vector<8x256xf32>, i32 -> vector<8x256xf32>
    %c6 = arith.constant 6 : index
    %c0_16 = arith.constant 0 : index
    %33 = vector.load %arg2[%c6, %c0_16] : memref<9x256xf32, #tpu.memory_space<vmem>>, vector<1x256xf32>
    %34 = vector.broadcast %33 : vector<1x256xf32> to vector<8x256xf32>
    %35 = arith.mulf %32, %34 : vector<8x256xf32>
    %c48 = arith.constant 48 : index
    %c0_17 = arith.constant 0 : index
    %36 = vector.load %arg6[%c48, %c0_17] : memref<73x256xf32, #tpu.memory_space<vmem>>, vector<8x256xf32>
    tpu.vector_store %arg6[%c48, %c0_17], %35 {strides = array<i32>} : memref<73x256xf32, #tpu.memory_space<vmem>>, vector<8x256xf32>,
    %c240_i32 = arith.constant 240 : i32
    %37 = tpu.dynamic_rotate %2 by %c240_i32 dim 1 : vector<8x256xf32>, i32 -> vector<8x256xf32>
    %c7 = arith.constant 7 : index
    %c0_18 = arith.constant 0 : index
    %38 = vector.load %arg2[%c7, %c0_18] : memref<9x256xf32, #tpu.memory_space<vmem>>, vector<1x256xf32>
    %39 = vector.broadcast %38 : vector<1x256xf32> to vector<8x256xf32>
    %40 = arith.mulf %37, %39 : vector<8x256xf32>
    %c56 = arith.constant 56 : index
    %c0_19 = arith.constant 0 : index
    %41 = vector.load %arg6[%c56, %c0_19] : memref<73x256xf32, #tpu.memory_space<vmem>>, vector<8x256xf32>
    tpu.vector_store %arg6[%c56, %c0_19], %40 {strides = array<i32>} : memref<73x256xf32, #tpu.memory_space<vmem>>, vector<8x256xf32>,
    %c239_i32 = arith.constant 239 : i32
    %42 = tpu.dynamic_rotate %2 by %c239_i32 dim 1 : vector<8x256xf32>, i32 -> vector<8x256xf32>
    %c8_20 = arith.constant 8 : index
    %c0_21 = arith.constant 0 : index
    %43 = vector.load %arg2[%c8_20, %c0_21] : memref<9x256xf32, #tpu.memory_space<vmem>>, vector<1x256xf32>
    %44 = vector.broadcast %43 : vector<1x256xf32> to vector<8x256xf32>
    %45 = arith.mulf %42, %44 : vector<8x256xf32>
    %c64 = arith.constant 64 : index
    %c0_22 = arith.constant 0 : index
    %46 = vector.load %arg6[%c64, %c0_22] : memref<73x256xf32, #tpu.memory_space<vmem>>, vector<8x256xf32>
    tpu.vector_store %arg6[%c64, %c0_22], %45 {strides = array<i32>} : memref<73x256xf32, #tpu.memory_space<vmem>>, vector<8x256xf32>,
    %c0_23 = arith.constant 0 : index
    %c0_24 = arith.constant 0 : index
    %47 = vector.load %arg3[%c0_23, %c0_24] : memref<8x73xf32, #tpu.memory_space<vmem>>, vector<8x73xf32>
    %c0_25 = arith.constant 0 : index
    %c0_26 = arith.constant 0 : index
    %48 = vector.load %arg6[%c0_25, %c0_26] : memref<73x256xf32, #tpu.memory_space<vmem>>, vector<73x256xf32>
    %cst_27 = arith.constant dense<0.000000e+00> : vector<8x256xf32>
    %49 = tpu.matmul %47, %48, %cst_27 {dimension_numbers = #tpu.dot_dimension_numbers<[1], [0], [0], [1], [0, 0, 1, 1], [], []>} : vector<8x73xf32>, vector<73x256xf32>, vector<8x256xf32> -> vector<8x256xf32>
    %cst_28 = arith.constant 0.000000e+00 : f32
    %50 = vector.broadcast %cst_28 : f32 to vector<8x256xf32>
    %51 = arith.maximumf %49, %50 : vector<8x256xf32>
    %c17_i32_29 = arith.constant 17 : i32
    %52 = tpu.dynamic_rotate %51 by %c17_i32_29 dim 1 : vector<8x256xf32>, i32 -> vector<8x256xf32>
    %c0_30 = arith.constant 0 : index
    %c0_31 = arith.constant 0 : index
    %53 = vector.load %arg2[%c0_30, %c0_31] : memref<9x256xf32, #tpu.memory_space<vmem>>, vector<1x256xf32>
    %54 = vector.broadcast %53 : vector<1x256xf32> to vector<8x256xf32>
    %55 = arith.mulf %52, %54 : vector<8x256xf32>
    %c0_32 = arith.constant 0 : index
    %c0_33 = arith.constant 0 : index
    %56 = vector.load %arg6[%c0_32, %c0_33] : memref<73x256xf32, #tpu.memory_space<vmem>>, vector<8x256xf32>
    tpu.vector_store %arg6[%c0_32, %c0_33], %55 {strides = array<i32>} : memref<73x256xf32, #tpu.memory_space<vmem>>, vector<8x256xf32>,
    %c16_i32_34 = arith.constant 16 : i32
    %57 = tpu.dynamic_rotate %51 by %c16_i32_34 dim 1 : vector<8x256xf32>, i32 -> vector<8x256xf32>
    %c1_35 = arith.constant 1 : index
    %c0_36 = arith.constant 0 : index
    %58 = vector.load %arg2[%c1_35, %c0_36] : memref<9x256xf32, #tpu.memory_space<vmem>>, vector<1x256xf32>
    %59 = vector.broadcast %58 : vector<1x256xf32> to vector<8x256xf32>
    %60 = arith.mulf %57, %59 : vector<8x256xf32>
    %c8_37 = arith.constant 8 : index
    %c0_38 = arith.constant 0 : index
    %61 = vector.load %arg6[%c8_37, %c0_38] : memref<73x256xf32, #tpu.memory_space<vmem>>, vector<8x256xf32>
    tpu.vector_store %arg6[%c8_37, %c0_38], %60 {strides = array<i32>} : memref<73x256xf32, #tpu.memory_space<vmem>>, vector<8x256xf32>,
    %c15_i32_39 = arith.constant 15 : i32
    %62 = tpu.dynamic_rotate %51 by %c15_i32_39 dim 1 : vector<8x256xf32>, i32 -> vector<8x256xf32>
    %c2_40 = arith.constant 2 : index
    %c0_41 = arith.constant 0 : index
    %63 = vector.load %arg2[%c2_40, %c0_41] : memref<9x256xf32, #tpu.memory_space<vmem>>, vector<1x256xf32>
    %64 = vector.broadcast %63 : vector<1x256xf32> to vector<8x256xf32>
    %65 = arith.mulf %62, %64 : vector<8x256xf32>
    %c16_42 = arith.constant 16 : index
    %c0_43 = arith.constant 0 : index
    %66 = vector.load %arg6[%c16_42, %c0_43] : memref<73x256xf32, #tpu.memory_space<vmem>>, vector<8x256xf32>
    tpu.vector_store %arg6[%c16_42, %c0_43], %65 {strides = array<i32>} : memref<73x256xf32, #tpu.memory_space<vmem>>, vector<8x256xf32>,
    %c1_i32_44 = arith.constant 1 : i32
    %67 = tpu.dynamic_rotate %51 by %c1_i32_44 dim 1 : vector<8x256xf32>, i32 -> vector<8x256xf32>
    %c3_45 = arith.constant 3 : index
    %c0_46 = arith.constant 0 : index
    %68 = vector.load %arg2[%c3_45, %c0_46] : memref<9x256xf32, #tpu.memory_space<vmem>>, vector<1x256xf32>
    %69 = vector.broadcast %68 : vector<1x256xf32> to vector<8x256xf32>
    %70 = arith.mulf %67, %69 : vector<8x256xf32>
    %c24_47 = arith.constant 24 : index
    %c0_48 = arith.constant 0 : index
    %71 = vector.load %arg6[%c24_47, %c0_48] : memref<73x256xf32, #tpu.memory_space<vmem>>, vector<8x256xf32>
    tpu.vector_store %arg6[%c24_47, %c0_48], %70 {strides = array<i32>} : memref<73x256xf32, #tpu.memory_space<vmem>>, vector<8x256xf32>,
    %c4_49 = arith.constant 4 : index
    %c0_50 = arith.constant 0 : index
    %72 = vector.load %arg2[%c4_49, %c0_50] : memref<9x256xf32, #tpu.memory_space<vmem>>, vector<1x256xf32>
    %73 = vector.broadcast %72 : vector<1x256xf32> to vector<8x256xf32>
    %74 = arith.mulf %51, %73 : vector<8x256xf32>
    %c32_51 = arith.constant 32 : index
    %c0_52 = arith.constant 0 : index
    %75 = vector.load %arg6[%c32_51, %c0_52] : memref<73x256xf32, #tpu.memory_space<vmem>>, vector<8x256xf32>
    tpu.vector_store %arg6[%c32_51, %c0_52], %74 {strides = array<i32>} : memref<73x256xf32, #tpu.memory_space<vmem>>, vector<8x256xf32>,
    %c255_i32_53 = arith.constant 255 : i32
    %76 = tpu.dynamic_rotate %51 by %c255_i32_53 dim 1 : vector<8x256xf32>, i32 -> vector<8x256xf32>
    %c5_54 = arith.constant 5 : index
    %c0_55 = arith.constant 0 : index
    %77 = vector.load %arg2[%c5_54, %c0_55] : memref<9x256xf32, #tpu.memory_space<vmem>>, vector<1x256xf32>
    %78 = vector.broadcast %77 : vector<1x256xf32> to vector<8x256xf32>
    %79 = arith.mulf %76, %78 : vector<8x256xf32>
    %c40_56 = arith.constant 40 : index
    %c0_57 = arith.constant 0 : index
    %80 = vector.load %arg6[%c40_56, %c0_57] : memref<73x256xf32, #tpu.memory_space<vmem>>, vector<8x256xf32>
    tpu.vector_store %arg6[%c40_56, %c0_57], %79 {strides = array<i32>} : memref<73x256xf32, #tpu.memory_space<vmem>>, vector<8x256xf32>,
    %c241_i32_58 = arith.constant 241 : i32
    %81 = tpu.dynamic_rotate %51 by %c241_i32_58 dim 1 : vector<8x256xf32>, i32 -> vector<8x256xf32>
    %c6_59 = arith.constant 6 : index
    %c0_60 = arith.constant 0 : index
    %82 = vector.load %arg2[%c6_59, %c0_60] : memref<9x256xf32, #tpu.memory_space<vmem>>, vector<1x256xf32>
    %83 = vector.broadcast %82 : vector<1x256xf32> to vector<8x256xf32>
    %84 = arith.mulf %81, %83 : vector<8x256xf32>
    %c48_61 = arith.constant 48 : index
    %c0_62 = arith.constant 0 : index
    %85 = vector.load %arg6[%c48_61, %c0_62] : memref<73x256xf32, #tpu.memory_space<vmem>>, vector<8x256xf32>
    tpu.vector_store %arg6[%c48_61, %c0_62], %84 {strides = array<i32>} : memref<73x256xf32, #tpu.memory_space<vmem>>, vector<8x256xf32>,
    %c240_i32_63 = arith.constant 240 : i32
    %86 = tpu.dynamic_rotate %51 by %c240_i32_63 dim 1 : vector<8x256xf32>, i32 -> vector<8x256xf32>
    %c7_64 = arith.constant 7 : index
    %c0_65 = arith.constant 0 : index
    %87 = vector.load %arg2[%c7_64, %c0_65] : memref<9x256xf32, #tpu.memory_space<vmem>>, vector<1x256xf32>
    %88 = vector.broadcast %87 : vector<1x256xf32> to vector<8x256xf32>
    %89 = arith.mulf %86, %88 : vector<8x256xf32>
    %c56_66 = arith.constant 56 : index
    %c0_67 = arith.constant 0 : index
    %90 = vector.load %arg6[%c56_66, %c0_67] : memref<73x256xf32, #tpu.memory_space<vmem>>, vector<8x256xf32>
    tpu.vector_store %arg6[%c56_66, %c0_67], %89 {strides = array<i32>} : memref<73x256xf32, #tpu.memory_space<vmem>>, vector<8x256xf32>,
    %c239_i32_68 = arith.constant 239 : i32
    %91 = tpu.dynamic_rotate %51 by %c239_i32_68 dim 1 : vector<8x256xf32>, i32 -> vector<8x256xf32>
    %c8_69 = arith.constant 8 : index
    %c0_70 = arith.constant 0 : index
    %92 = vector.load %arg2[%c8_69, %c0_70] : memref<9x256xf32, #tpu.memory_space<vmem>>, vector<1x256xf32>
    %93 = vector.broadcast %92 : vector<1x256xf32> to vector<8x256xf32>
    %94 = arith.mulf %91, %93 : vector<8x256xf32>
    %c64_71 = arith.constant 64 : index
    %c0_72 = arith.constant 0 : index
    %95 = vector.load %arg6[%c64_71, %c0_72] : memref<73x256xf32, #tpu.memory_space<vmem>>, vector<8x256xf32>
    tpu.vector_store %arg6[%c64_71, %c0_72], %94 {strides = array<i32>} : memref<73x256xf32, #tpu.memory_space<vmem>>, vector<8x256xf32>,
    %c0_73 = arith.constant 0 : index
    %c0_74 = arith.constant 0 : index
    %96 = vector.load %arg4[%c0_73, %c0_74] : memref<8x73xf32, #tpu.memory_space<vmem>>, vector<8x73xf32>
    %c0_75 = arith.constant 0 : index
    %c0_76 = arith.constant 0 : index
    %97 = vector.load %arg6[%c0_75, %c0_76] : memref<73x256xf32, #tpu.memory_space<vmem>>, vector<73x256xf32>
    %cst_77 = arith.constant dense<0.000000e+00> : vector<8x256xf32>
    %98 = tpu.matmul %96, %97, %cst_77 {dimension_numbers = #tpu.dot_dimension_numbers<[1], [0], [0], [1], [0, 0, 1, 1], [], []>} : vector<8x73xf32>, vector<73x256xf32>, vector<8x256xf32> -> vector<8x256xf32>
    %99 = arith.addf %2, %98 : vector<8x256xf32>
    %c0_78 = arith.constant 0 : index
    %c0_79 = arith.constant 0 : index
    %100 = vector.load %arg5[%c0_78, %c0_79] : memref<8x256xf32, #tpu.memory_space<vmem>>, vector<8x256xf32>
    tpu.vector_store %arg5[%c0_78, %c0_79], %99 {strides = array<i32>} : memref<8x256xf32, #tpu.memory_space<vmem>>, vector<8x256xf32>,
    return
  }
  func.func @transform_0(%arg0: i32) -> (i32, i32) {
    %c0_i32 = arith.constant 0 : i32
    %c0_i32_0 = arith.constant 0 : i32
    return %c0_i32, %arg0 : i32, i32
  }
  func.func @transform_1(%arg0: i32) -> (i32, i32) {
    %c0_i32 = arith.constant 0 : i32
    %c0_i32_0 = arith.constant 0 : i32
    %c0_i32_1 = arith.constant 0 : i32
    return %c0_i32, %c0_i32_0 : i32, i32
  }
  func.func @transform_2(%arg0: i32) -> (i32, i32) {
    %c0_i32 = arith.constant 0 : i32
    %c0_i32_0 = arith.constant 0 : i32
    %c0_i32_1 = arith.constant 0 : i32
    return %c0_i32, %c0_i32_0 : i32, i32
  }
  func.func @transform_3(%arg0: i32) -> (i32, i32) {
    %c0_i32 = arith.constant 0 : i32
    %c0_i32_0 = arith.constant 0 : i32
    %c0_i32_1 = arith.constant 0 : i32
    return %c0_i32, %c0_i32_0 : i32, i32
  }
  func.func @transform_4(%arg0: i32) -> (i32, i32) {
    %c0_i32 = arith.constant 0 : i32
    %c0_i32_0 = arith.constant 0 : i32
    return %c0_i32, %arg0 : i32, i32
  }
}

</mosaic_0001>

<bundles_post_ra>
// kernel: tpu_custom_call.1
= control target key start
LH: loop header
LB: loop body
LE: loop exit
PB: predicated region body
PF: predicated region fallthrough
CT: control target
= control target key end

     0   :  { %9 = vsyncpa [#allocation4], 0  ;;  %s1135_s0 = inlined_call_operand.hbm [shape: f32[8,256], index: 0, kind: input, shape index: {}]   ;;  %s1136_s1 = inlined_call_operand.hbm [shape: f32[9,256], index: 1, kind: input, shape index: {}]   ;;  %s1137_s2 = inlined_call_operand.hbm [shape: f32[8,73], index: 2, kind: input, shape index: {}]   ;;  %s1138_s3 = inlined_call_operand.vmem [shape: f32[8,73], index: 3, kind: input, shape index: {}]   ;;  %s1139_s4 = inlined_call_operand.hbm [shape: f32[8,256], index: 4, kind: output, shape index: {}]  }
   0x1   :  { %10 = vsyncpa [#allocation7], 0 }
   0x2   :  { %11 = vsyncpa [#allocation5], 0  ;;  %s852_s15 = smov [#allocation6]   ;;  %s758_s19 = scalar_lea.hbm %s1136_s1, 512 }
   0x3   :  { %s27_s16 = sshll.u32 %s852_s15, 4  ;;  %p759_p0 = scmp.ne.s32.totalorder %s1136_s1, %s758_s19  ;;  %s28_s16 = int_to_ptr.vmem [resolvable:$true] %s27_s16 }
   0x4   :  { %p762_p1 = scmp.lt.u32.totalorder %s758_s19, %s1136_s1 }
   0x6   :  { %p764_p2 = pnand %p762_p1, %p759_p0 }
   0x8   :  { %767 = shalt.err (!%p764_p2)
}
   0x9   :  { %s768_s24 = scalar_lea.vmem %s28_s16, 512  ;;  %p773_p4 = scmp.lt.s32.totalorder %s28_s16, %s28_s16 }
   0xa   :  { %p769_p3 = scmp.ne.s32.totalorder %s28_s16, %s768_s24  ;;  %p774_p5 = scmp.lt.s32.totalorder %s768_s24, %s768_s24 }
   0xc   :  { %p775_p6 = por %p774_p5, %p773_p4 }
   0xe   :  { %p776_p7 = pnand %p775_p6, %p769_p3 }
  0x10   :  { %779 = shalt.err (!%p776_p7)
}
  0x11   :  { %s853_s25 = smov 256   ;;  %s854_s26 = smov 16  }
  0x12   :  { %33 = dma.hbm_to_vmem [thread:$0]  %s1136_s1, 512, %s28_s16, [#allocation7], %s853_s25, %s853_s25, %s854_s26  }
  0x13   :  { %s855_s29 = smov [#allocation3]   ;;  %s856_s5 = smov [#allocation8]  }
  0x14   :  { %s18_s30 = sshll.u32 %s855_s29, 4  ;;  %s40_s6 = sshll.u32 %s856_s5, 4  ;;  %s19_s30 = int_to_ptr.vmem [resolvable:$true] %s18_s30  ;;  %s41_s6 = int_to_ptr.vmem [resolvable:$true] %s40_s6 }
  0x15   :  { %s780_s9 = scalar_lea.hbm %s1135_s0, 256 }
  0x16   :  { %p781_p8 = scmp.ne.s32.totalorder %s1135_s0, %s780_s9  ;;  %p784_p9 = scmp.lt.u32.totalorder %s780_s9, %s1135_s0 }
  0x18   :  { %p786_p10 = pnand %p784_p9, %p781_p8 }
  0x1a   :  { %789 = shalt.err (!%p786_p10)
}
  0x1b   :  { %s790_s1 = scalar_lea.vmem %s19_s30, 256  ;;  %p795_p12 = scmp.lt.s32.totalorder %s19_s30, %s19_s30 }
  0x1c   :  { %p791_p11 = scmp.ne.s32.totalorder %s19_s30, %s790_s1  ;;  %p796_p13 = scmp.lt.s32.totalorder %s790_s1, %s790_s1 }
  0x1e   :  { %p797_p0 = por %p796_p13, %p795_p12 }
  0x20   :  { %p798_p1 = pnand %p797_p0, %p791_p11 }
  0x22   :  { %801 = shalt.err (!%p798_p1)
}
  0x23   :  { %21 = dma.hbm_to_vmem [thread:$0]  %s1135_s0, 256, %s19_s30, [#allocation4]  }
  0x24   :  { %s802_s18 = scalar_lea.hbm %s1137_s2, 128 }
  0x25   :  { %p803_p2 = scmp.ne.s32.totalorder %s1137_s2, %s802_s18  ;;  %p806_p3 = scmp.lt.u32.totalorder %s802_s18, %s1137_s2 }
  0x27   :  { %p808_p4 = pnand %p806_p3, %p803_p2 }
  0x29   :  { %811 = shalt.err (!%p808_p4)
}
  0x2a   :  { %s812_s23 = scalar_lea.vmem %s41_s6, 128  ;;  %p817_p6 = scmp.lt.s32.totalorder %s41_s6, %s41_s6 }
  0x2b   :  { %p813_p5 = scmp.ne.s32.totalorder %s41_s6, %s812_s23  ;;  %p818_p7 = scmp.lt.s32.totalorder %s812_s23, %s812_s23 }
  0x2d   :  { %p819_p8 = por %p818_p7, %p817_p6 }
  0x2f   :  { %p820_p9 = pnand %p819_p8, %p813_p5 }
  0x31   :  { %823 = shalt.err (!%p820_p9)
}
  0x32   :  { %43 = dma.hbm_to_vmem [thread:$0]  %s1137_s2, 128, %s41_s6, [#allocation7]  }
  0x33   :  { %846 = dma.done.wait [#allocation4], 256  }
  0x34   :  { %847 = vsyncadd [#allocation4], 4294967040 }
  0x35   :  { %848 = dma.done.wait [#allocation7], 640  }
  0x36   :  { %849 = vsyncadd [#allocation7], 4294966656  ;;  %v930_v0 = vld [vmem:[#allocation3] sm:$0xff]  ;;  %s857_s25 = smov 17   ;;  %v936_v1 = vld [vmem:[#allocation3 + $0x8] sm:$0xff]  ;;  %v55_v2 = vlaneseq  ;;  %s858_s2 = smov 15  }
  0x37   :  { %89 = vrot.lane.b32.xlu1 %v930_v0, %s854_s26  ;;  %64 = vrot.lane.b32.xlu0 %v930_v0, %s857_s25  ;;  %v859_v3 = vmov 1.0   ;;  %s860_s27 = smov 1   ;;  %s861_s28 = smov 127   ;;  %v863_v4 = vmov 0.0   ;;  %vm299_vm9 = vcmask 1040384   ;;  %vm866_vm10 = vmmov 1  }
  0x38   :  { %vm57_vm0 = vcmp.lt.s32.totalorder %v55_v2, 256  ;;  %s862_s29 = smov 113   ;;  %370 = vmatprep.mubr.f32.mxu0 %v863_v4  ;;  %665 = vmatprep.mubr.f32.mxu1 %v863_v4  ;;  %s864_s30 = smov 112   ;;  %v76_v5 = vshrl.u32 %v55_v2, 7  ;;  %v966_v6 = vand.u32 127, %v55_v2  ;;  %vm1032_vm11 = vmpackc.low %vm299_vm9, %vm866_vm10  ;;  %vm295_vm12 = vcmask 596992  }
  0x39   :  { %60 = vst.msk [vmem:[#allocation2 + $0x90] ss:$8 sm:$0x3] %vm57_vm0, %v859_v3  ;;  %s865_s5 = smov 111   ;;  %s867_s7 = smov [#allocation9]  }
  0x3a   :  { %v968_v7 = vsub.s32 0, %v76_v5  ;;  %v970_v8 = vsub.s32 1, %v76_v5  ;;  %v97_v9 = vld [vmem:[#allocation6 + $0x1] ss:$8 sm:$0x3]  ;;  %vm93_vm1 = vcmp.lt.s32.totalorder %v966_v6, 16 }
  0x3b   :  { %91 = vrot.lane.b32.xlu1 %v936_v1, %s854_s26  ;;  %66 = vrot.lane.b32.xlu0 %v936_v1, %s857_s25  ;;  %v73_v10 = vld [vmem:[#allocation6] ss:$8 sm:$0x3]  ;;  %vm70_vm2 = vcmp.lt.s32.totalorder %v966_v6, 17  ;;  %vm117_vm3 = vcmp.lt.s32.totalorder %v966_v6, 15  ;;  %vm141_vm4 = vcmp.lt.s32.totalorder %v966_v6, 1 }
  0x3c   :  { %v102_v13 = vrot.slane %v97_v9, %v968_v7  ;;  %v106_v14 = vrot.slane %v97_v9, %v970_v8  ;;  %v78_v15 = vrot.slane %v73_v10, %v968_v7  ;;  %v82_v16 = vrot.slane %v73_v10, %v970_v8  ;;  %v121_v27 = vld [vmem:[#allocation6 + $0x2] ss:$8 sm:$0x3]  ;;  %v145_v28 = vld [vmem:[#allocation6 + $0x3] ss:$8 sm:$0x3] }
  0x3d   :  { %v162_v33 = vld [vmem:[#allocation6 + $0x4] ss:$8 sm:$0x3]  ;;  %v126_v34 = vrot.slane %v121_v27, %v968_v7  ;;  %v130_v35 = vrot.slane %v121_v27, %v970_v8  ;;  %v150_v36 = vrot.slane %v145_v28, %v968_v7  ;;  %v154_v37 = vrot.slane %v145_v28, %v970_v8  ;;  %v186_v38 = vld [vmem:[#allocation6 + $0x5] ss:$8 sm:$0x3] }
  0x3e   :  { %vm182_vm5 = vcmp.lt.s32.totalorder %v966_v6, 127  ;;  %v171_v43 = vrot.slane %v162_v33, %v970_v8  ;;  %v167_v44 = vrot.slane %v162_v33, %v968_v7  ;;  %v191_v47 = vrot.slane %v186_v38, %v968_v7  ;;  %v210_v63 = vld [vmem:[#allocation6 + $0x6] ss:$8 sm:$0x3]  ;;  %s682_s8 = sshll.u32 %s867_s7, 4  ;;  %s683_s8 = int_to_ptr.vmem [resolvable:$true] %s682_s8 }
  0x3f   :  { %115 = vrot.lane.b32.xlu1 %v936_v1, %s858_s2  ;;  %113 = vrot.lane.b32.xlu0 %v930_v0, %s858_s2  ;;  %v195_v48 = vrot.slane %v186_v38, %v970_v8  ;;  %v234_v2 = vld [vmem:[#allocation6 + $0x7] ss:$8 sm:$0x3]  ;;  %vm206_vm6 = vcmp.lt.s32.totalorder %v966_v6, 113  ;;  %v215_v10 = vrot.slane %v210_v63, %v968_v7  ;;  %vm230_vm7 = vcmp.lt.s32.totalorder %v966_v6, 112  ;;  %s824_s9 = scalar_lea.vmem %s683_s8, 256  ;;  %p829_p11 = scmp.lt.s32.totalorder %s683_s8, %s683_s8 }
  0x40   :  { %v175_v57 = vmul.f32 %v171_v43, %v936_v1  ;;  %v174_v58 = vmul.f32 %v167_v44, %v930_v0  ;;  %vm254_vm8 = vcmp.lt.s32.totalorder %v966_v6, 111  ;;  %v294_v33 = vld [vmem:[#allocation2 + $0x98] sm:$0x1]  ;;  %p825_p10 = scmp.ne.s32.totalorder %s683_s8, %s824_s9  ;;  %p830_p12 = scmp.lt.s32.totalorder %s824_s9, %s824_s9 }
  0x42   :  { %p831_p13 = por %p830_p12, %p829_p11 }
  0x43   :  { %139 = vrot.lane.b32.xlu1 %v936_v1, %s860_s27  ;;  %137 = vrot.lane.b32.xlu0 %v930_v0, %s860_s27 }
  0x44   :  { %p832_p0 = pnand %p831_p13, %p825_p10 }
  0x47   :  { %180 = vrot.lane.b32.xlu1 %v936_v1, %s861_s28  ;;  %178 = vrot.lane.b32.xlu0 %v930_v0, %s861_s28 }
  0x4b   :  { %204 = vrot.lane.b32.xlu1 %v936_v1, %s862_s29  ;;  %202 = vrot.lane.b32.xlu0 %v930_v0, %s862_s29 }
  0x4f   :  { %228 = vrot.lane.b32.xlu1 %v936_v1, %s864_s30  ;;  %226 = vrot.lane.b32.xlu0 %v930_v0, %s864_s30 }
  0x53   :  { %252 = vrot.lane.b32.xlu1 %v936_v1, %s865_s5  ;;  %250 = vrot.lane.b32.xlu0 %v930_v0, %s865_s5 }
  0xa9   :  { %v90_v11 = vpop.permute.xlu1 %89  ;;  %v65_v12 = vpop.permute.xlu0 %64 }
  0xad   :  { %v92_v17 = vpop.permute.xlu1 %91  ;;  %v67_v18 = vpop.permute.xlu0 %66 }
  0xae   :  { %v94_v19 = vsel %vm93_vm1, %v90_v11, %v92_v17  ;;  %v95_v20 = vsel %vm93_vm1, %v92_v17, %v90_v11  ;;  %v71_v21 = vsel %vm70_vm2, %v65_v12, %v67_v18  ;;  %v72_v22 = vsel %vm70_vm2, %v67_v18, %v65_v12 }
  0xaf   :  { %v109_v23 = vmul.f32 %v102_v13, %v95_v20  ;;  %v110_v24 = vmul.f32 %v106_v14, %v94_v19  ;;  %v85_v25 = vmul.f32 %v78_v15, %v72_v22  ;;  %v86_v26 = vmul.f32 %v82_v16, %v71_v21  ;;  %v258_v14 = vld [vmem:[#allocation6 + $0x10] ss:$8 sm:$0x3] }
  0xb0   :  { %v219_v11 = vrot.slane %v210_v63, %v970_v8  ;;  %v239_v12 = vrot.slane %v234_v2, %v968_v7  ;;  %v243_v13 = vrot.slane %v234_v2, %v970_v8  ;;  %v263_v21 = vrot.slane %v258_v14, %v968_v7  ;;  %v429_v63 = vld [vmem:[#allocation6 + $0x2] ss:$8 sm:$0x3] }
  0xb1   :  { %v116_v29 = vpop.permute.xlu1 %115  ;;  %v114_v30 = vpop.permute.xlu0 %113  ;;  %v698_v31 = vpack.c.bf16 %v110_v24, %v86_v26  ;;  %v700_v32 = vpack.c.bf16 %v109_v23, %v85_v25  ;;  %v267_v22 = vrot.slane %v258_v14, %v970_v8 }
  0xb2   :  { %v118_v39 = vsel %vm117_vm3, %v114_v30, %v116_v29  ;;  %v119_v40 = vsel %vm117_vm3, %v116_v29, %v114_v30 }
  0xb3   :  { %699 = vmatprep.subr.bf16.mxu0 %v698_v31  ;;  %v133_v49 = vmul.f32 %v126_v34, %v119_v40  ;;  %v134_v50 = vmul.f32 %v130_v35, %v118_v39  ;;  %v293_v34 = vld [vmem:[#allocation2 + $0x90] sm:$0x1] }
  0xb4   :  { %701 = vmatpush1.bf16.msra.mxu0 %v700_v32  ;;  %v274_v40 = vld [vmem:[#allocation8] sm:$0xff] }
  0xb5   :  { %v140_v41 = vpop.permute.xlu1 %139  ;;  %v138_v42 = vpop.permute.xlu0 %137 }
  0xb6   :  { %v142_v45 = vsel %vm141_vm4, %v138_v42, %v140_v41  ;;  %v143_v46 = vsel %vm141_vm4, %v140_v41, %v138_v42  ;;  %v467_v41 = vld [vmem:[#allocation6 + $0x4] ss:$8 sm:$0x3] }
  0xb7   :  { %v157_v51 = vmul.f32 %v150_v36, %v143_v46  ;;  %v158_v52 = vmul.f32 %v154_v37, %v142_v45  ;;  %v472_v42 = vrot.slane %v467_v41, %v968_v7  ;;  %v476_v44 = vrot.slane %v467_v41, %v970_v8 }
  0xb9   :  { %v181_v53 = vpop.permute.xlu1 %180  ;;  %v179_v54 = vpop.permute.xlu0 %178  ;;  %v702_v55 = vpack.c.bf16 %v158_v52, %v134_v50  ;;  %v704_v56 = vpack.c.bf16 %v157_v51, %v133_v49  ;;  %v385_v50 = vld [vmem:[#allocation6] ss:$8 sm:$0x3] }
  0xba   :  { %v183_v59 = vsel %vm182_vm5, %v179_v54, %v181_v53  ;;  %v184_v60 = vsel %vm182_vm5, %v181_v53, %v179_v54  ;;  %v390_v51 = vrot.slane %v385_v50, %v968_v7  ;;  %v394_v52 = vrot.slane %v385_v50, %v970_v8  ;;  %v407_v54 = vld [vmem:[#allocation6 + $0x1] ss:$8 sm:$0x3] }
  0xbb   :  { %v198_v61 = vmul.f32 %v191_v47, %v183_v59  ;;  %v199_v62 = vmul.f32 %v195_v48, %v184_v60  ;;  %703 = vmatprep.subr.bf16.mxu0 %v702_v55  ;;  %v412_v60 = vrot.slane %v407_v54, %v968_v7 }
  0xbc   :  { %705 = vmatpush1.bf16.msra.mxu0 %v704_v56 }
  0xbd   :  { %v205_v3 = vpop.permute.xlu1 %204  ;;  %v203_v4 = vpop.permute.xlu0 %202  ;;  %v706_v5 = vpack.c.bf16 %v199_v62, %v175_v57  ;;  %v708_v9 = vpack.c.bf16 %v198_v61, %v174_v58  ;;  %v416_v61 = vrot.slane %v407_v54, %v970_v8 }
  0xbe   :  { %v207_v15 = vsel %vm206_vm6, %v203_v4, %v205_v3  ;;  %v208_v16 = vsel %vm206_vm6, %v205_v3, %v203_v4 }
  0xbf   :  { %707 = vmatprep.subr.bf16.mxu0 %v706_v5  ;;  %v222_v23 = vmul.f32 %v215_v10, %v207_v15  ;;  %v223_v24 = vmul.f32 %v219_v11, %v208_v16  ;;  %v434_v10 = vrot.slane %v429_v63, %v968_v7  ;;  %v438_v11 = vrot.slane %v429_v63, %v970_v8 }
  0xc0   :  { %709 = vmatpush1.bf16.msra.mxu0 %v708_v9 }
  0xc1   :  { %v229_v17 = vpop.permute.xlu1 %228  ;;  %v227_v18 = vpop.permute.xlu0 %226 }
  0xc2   :  { %v231_v19 = vsel %vm230_vm7, %v227_v18, %v229_v17  ;;  %v232_v20 = vsel %vm230_vm7, %v229_v17, %v227_v18 }
  0xc3   :  { %v246_v25 = vmul.f32 %v239_v12, %v231_v19  ;;  %v247_v26 = vmul.f32 %v243_v13, %v232_v20  ;;  %v451_v13 = vld [vmem:[#allocation6 + $0x3] ss:$8 sm:$0x3] }
  0xc5   :  { %v253_v27 = vpop.permute.xlu1 %252  ;;  %v251_v28 = vpop.permute.xlu0 %250  ;;  %v710_v29 = vpack.c.bf16 %v247_v26, %v223_v24  ;;  %v712_v30 = vpack.c.bf16 %v246_v25, %v222_v23  ;;  %v489_v24 = vld [vmem:[#allocation6 + $0x5] ss:$8 sm:$0x3] }
  0xc6   :  { %v255_v31 = vsel %vm254_vm8, %v251_v28, %v253_v27  ;;  %v256_v32 = vsel %vm254_vm8, %v253_v27, %v251_v28 }
  0xc7   :  { %v270_v35 = vmul.f32 %v263_v21, %v255_v31  ;;  %v271_v36 = vmul.f32 %v267_v22, %v256_v32  ;;  %711 = vmatprep.subr.bf16.mxu0 %v710_v29  ;;  %v456_v21 = vrot.slane %v451_v13, %v968_v7  ;;  %v460_v22 = vrot.slane %v451_v13, %v970_v8 }
  0xc8   :  { %713 = vmatpush1.bf16.msra.mxu0 %v712_v30  ;;  %v494_v30 = vrot.slane %v489_v24, %v968_v7  ;;  %v498_v31 = vrot.slane %v489_v24, %v970_v8 }
  0xc9   :  { %v714_v38 = vpack.c.bf16 %v294_v33, %v271_v36  ;;  %v717_v39 = vpack.c.bf16 %v293_v34, %v270_v35  ;;  %v511_v33 = vld [vmem:[#allocation6 + $0x6] ss:$8 sm:$0x3] }
  0xcb   :  { %716 = vmatprep.subr.msk.bf16.mxu0 %vm1032_vm11, %v714_v38 }
  0xcc   :  { %719 = vmatpush1.bf16.msk.msra.mxu0 %vm1032_vm11, %v717_v39 }
  0xcf   :  { %694 = vmatmul.mubr.msk.f32.vlgmr.msra.gmra.mrb[0].mxu0 %vm295_vm12, %v274_v40 }
 0x1a2   :  { %v372_v43 = vpop.f32.mrb[0].mxu0 }
 0x1a3   :  { %v377_v45 = vmax.f32 %v372_v43, 0.0  ;;  %v374_v46 = vpop.f32.mrb[1].mxu0  ;;  %v520_v43 = vrot.slane %v511_v33, %v970_v8 }
 0x1a4   :  { %v378_v47 = vmax.f32 %v374_v46, 0.0 }
 0x1a5   :  { %v1043_v48 = vmul.f32 %v472_v42, %v377_v45  ;;  %379 = vrot.lane.b32.xlu0 %v377_v45, %s857_s25  ;;  %v516_v42 = vrot.slane %v511_v33, %v968_v7 }
 0x1a6   :  { %v1046_v49 = vmul.f32 %v476_v44, %v378_v47  ;;  %381 = vrot.lane.b32.xlu1 %v378_v47, %s857_s25 }
 0x1a9   :  { %401 = vrot.lane.b32.xlu0 %v377_v45, %s854_s26 }
 0x1aa   :  { %403 = vrot.lane.b32.xlu1 %v378_v47, %s854_s26 }
 0x1ad   :  { %423 = vrot.lane.b32.xlu0 %v377_v45, %s858_s2 }
 0x1ae   :  { %425 = vrot.lane.b32.xlu1 %v378_v47, %s858_s2 }
 0x1b1   :  { %445 = vrot.lane.b32.xlu0 %v377_v45, %s860_s27 }
 0x1b2   :  { %447 = vrot.lane.b32.xlu1 %v378_v47, %s860_s27 }
 0x1b5   :  { %483 = vrot.lane.b32.xlu0 %v377_v45, %s861_s28 }
 0x1b6   :  { %485 = vrot.lane.b32.xlu1 %v378_v47, %s861_s28 }
 0x1b9   :  { %505 = vrot.lane.b32.xlu0 %v377_v45, %s862_s29 }
 0x1ba   :  { %507 = vrot.lane.b32.xlu1 %v378_v47, %s862_s29 }
 0x1bd   :  { %527 = vrot.lane.b32.xlu0 %v377_v45, %s864_s30 }
 0x1be   :  { %529 = vrot.lane.b32.xlu1 %v378_v47, %s864_s30 }
 0x1c1   :  { %549 = vrot.lane.b32.xlu0 %v377_v45, %s865_s5  ;;  %v533_v45 = vld [vmem:[#allocation6 + $0x7] ss:$8 sm:$0x3] }
 0x1c2   :  { %551 = vrot.lane.b32.xlu1 %v378_v47, %s865_s5 }
 0x217   :  { %v380_v53 = vpop.permute.xlu0 %379 }
 0x218   :  { %v382_v55 = vpop.permute.xlu1 %381 }
 0x219   :  { %v383_v56 = vsel %vm70_vm2, %v380_v53, %v382_v55  ;;  %v384_v57 = vsel %vm70_vm2, %v382_v55, %v380_v53  ;;  %v538_v55 = vrot.slane %v533_v45, %v968_v7 }
 0x21a   :  { %v397_v58 = vmul.f32 %v390_v51, %v384_v57  ;;  %v398_v59 = vmul.f32 %v394_v52, %v383_v56  ;;  %v542_v56 = vrot.slane %v533_v45, %v970_v8 }
 0x21b   :  { %v402_v62 = vpop.permute.xlu0 %401 }
 0x21c   :  { %v404_v2 = vpop.permute.xlu1 %403 }
 0x21d   :  { %v405_v3 = vsel %vm93_vm1, %v402_v62, %v404_v2  ;;  %v406_v4 = vsel %vm93_vm1, %v404_v2, %v402_v62 }
 0x21e   :  { %v419_v5 = vmul.f32 %v412_v60, %v406_v4  ;;  %v420_v9 = vmul.f32 %v416_v61, %v405_v3 }
 0x21f   :  { %v424_v12 = vpop.permute.xlu0 %423 }
 0x220   :  { %v426_v14 = vpop.permute.xlu1 %425  ;;  %v720_v15 = vpack.c.bf16 %v420_v9, %v398_v59  ;;  %v722_v16 = vpack.c.bf16 %v419_v5, %v397_v58  ;;  %v555_v58 = vld [vmem:[#allocation6 + $0x10] ss:$8 sm:$0x3] }
 0x221   :  { %v427_v17 = vsel %vm117_vm3, %v424_v12, %v426_v14  ;;  %v428_v18 = vsel %vm117_vm3, %v426_v14, %v424_v12  ;;  %v560_v62 = vrot.slane %v555_v58, %v968_v7  ;;  %v564_v63 = vrot.slane %v555_v58, %v970_v8  ;;  %v590_v12 = vld [vmem:[#allocation2 + $0x90] sm:$0x1]  ;;  %v571_v8 = vld [vmem:[%s1138_s3] sm:$0xff] }
 0x222   :  { %v441_v19 = vmul.f32 %v434_v10, %v428_v18  ;;  %v442_v20 = vmul.f32 %v438_v11, %v427_v17  ;;  %721 = vmatprep.subr.bf16.mxu1 %v720_v15  ;;  %v591_v11 = vld [vmem:[#allocation2 + $0x98] sm:$0x1] }
 0x223   :  { %v446_v23 = vpop.permute.xlu0 %445  ;;  %723 = vmatpush1.bf16.msra.mxu1 %v722_v16 }
 0x224   :  { %v448_v25 = vpop.permute.xlu1 %447 }
 0x225   :  { %v449_v26 = vsel %vm141_vm4, %v446_v23, %v448_v25  ;;  %v450_v27 = vsel %vm141_vm4, %v448_v25, %v446_v23 }
 0x226   :  { %v463_v28 = vmul.f32 %v456_v21, %v450_v27  ;;  %v464_v29 = vmul.f32 %v460_v22, %v449_v26 }
 0x227   :  { %v484_v32 = vpop.permute.xlu0 %483 }
 0x228   :  { %v486_v34 = vpop.permute.xlu1 %485  ;;  %v724_v35 = vpack.c.bf16 %v464_v29, %v442_v20  ;;  %v726_v36 = vpack.c.bf16 %v463_v28, %v441_v19 }
 0x229   :  { %v487_v38 = vsel %vm182_vm5, %v484_v32, %v486_v34  ;;  %v488_v39 = vsel %vm182_vm5, %v486_v34, %v484_v32 }
 0x22a   :  { %v501_v40 = vmul.f32 %v494_v30, %v487_v38  ;;  %v502_v41 = vmul.f32 %v498_v31, %v488_v39  ;;  %725 = vmatprep.subr.bf16.mxu1 %v724_v35 }
 0x22b   :  { %v506_v44 = vpop.permute.xlu0 %505  ;;  %727 = vmatpush1.bf16.msra.mxu1 %v726_v36 }
 0x22c   :  { %v508_v46 = vpop.permute.xlu1 %507  ;;  %v728_v47 = vpack.c.bf16 %v502_v41, %v1046_v49  ;;  %v730_v50 = vpack.c.bf16 %v501_v40, %v1043_v48 }
 0x22d   :  { %v509_v51 = vsel %vm206_vm6, %v506_v44, %v508_v46  ;;  %v510_v52 = vsel %vm206_vm6, %v508_v46, %v506_v44 }
 0x22e   :  { %v523_v53 = vmul.f32 %v516_v42, %v509_v51  ;;  %v524_v54 = vmul.f32 %v520_v43, %v510_v52  ;;  %729 = vmatprep.subr.bf16.mxu1 %v728_v47 }
 0x22f   :  { %v528_v57 = vpop.permute.xlu0 %527  ;;  %731 = vmatpush1.bf16.msra.mxu1 %v730_v50 }
 0x230   :  { %v530_v59 = vpop.permute.xlu1 %529 }
 0x231   :  { %v531_v48 = vsel %vm230_vm7, %v528_v57, %v530_v59  ;;  %v532_v49 = vsel %vm230_vm7, %v530_v59, %v528_v57 }
 0x232   :  { %v545_v60 = vmul.f32 %v538_v55, %v531_v48  ;;  %v546_v61 = vmul.f32 %v542_v56, %v532_v49 }
 0x233   :  { %v550_v2 = vpop.permute.xlu0 %549 }
 0x234   :  { %v552_v3 = vpop.permute.xlu1 %551  ;;  %v732_v4 = vpack.c.bf16 %v546_v61, %v524_v54  ;;  %v734_v5 = vpack.c.bf16 %v545_v60, %v523_v53 }
 0x235   :  { %v553_v9 = vsel %vm254_vm8, %v550_v2, %v552_v3  ;;  %v554_v10 = vsel %vm254_vm8, %v552_v3, %v550_v2 }
 0x236   :  { %v567_v13 = vmul.f32 %v560_v62, %v553_v9  ;;  %v568_v14 = vmul.f32 %v564_v63, %v554_v10  ;;  %733 = vmatprep.subr.bf16.mxu1 %v732_v4 }
 0x237   :  { %735 = vmatpush1.bf16.msra.mxu1 %v734_v5 }
 0x238   :  { %v736_v15 = vpack.c.bf16 %v591_v11, %v568_v14  ;;  %v739_v7 = vpack.c.bf16 %v590_v12, %v567_v13 }
 0x23a   :  { %738 = vmatprep.subr.msk.bf16.mxu1 %vm1032_vm11, %v736_v15 }
 0x23b   :  { %741 = vmatpush1.bf16.msk.msra.mxu1 %vm1032_vm11, %v739_v7 }
 0x23e   :  { %697 = vmatmul.mubr.msk.f32.vlgmr.msra.gmra.mrb[0].mxu1 %vm295_vm12, %v571_v8 }
 0x311   :  { %v667_v6 = vpop.f32.mrb[0].mxu1 }
 0x312   :  { %v672_v16 = vadd.f32 %v667_v6, %v930_v0  ;;  %v669_v17 = vpop.f32.mrb[1].mxu1 }
 0x313   :  { %v673_v18 = vadd.f32 %v669_v17, %v936_v1 }
 0x314   :  { %674 = vst [vmem:[#allocation9] sm:$0xff] %v672_v16 }
 0x315   :  { %675 = vst [vmem:[#allocation9 + $0x8] sm:$0xff] %v673_v18 }
 0x316   :  { %835 = shalt.err (!%p832_p0)
}
 0x317   :  { %s836_s11 = scalar_lea.hbm %s1139_s4, 256 }
 0x318   :  { %p837_p1 = scmp.ne.s32.totalorder %s1139_s4, %s836_s11  ;;  %p840_p2 = scmp.lt.u32.totalorder %s836_s11, %s1139_s4 }
 0x31a   :  { %p842_p3 = pnand %p840_p2, %p837_p1 }
 0x31c   :  { %845 = shalt.err (!%p842_p3)
}
 0x31d   :  { %685 = dma.vmem_to_hbm [thread:$0]  %s683_s8, 256, %s1139_s4, [#allocation5]  }
 0x31e   :  { %850 = dma.done.wait [#allocation5], 256  }
 0x31f   :  { %851 = vsyncadd [#allocation5], 4294967040 }
 0x320   :  { %689 = vsyncpa [#allocation4], 1 }
 0x321   :  { %690 = vsyncpa [#allocation7], 1 }
 0x322   :  { %691 = vsyncpa [#allocation5], 1 }

</bundles_post_ra>
